<compile_context>
chip_gen: v7x
topology: tpu7x:2x2x1
jax: 0.10.0
libtpu: 0.0.40
codegen_flags: <defaults>
</compile_context>

<pallas_src>
import copy
import random

import jax
import jax.numpy as jnp
import numpy as np
from jax.experimental import pallas as pl
from jax.experimental.pallas import tpu as pltpu


# -----------------------------------------------------------------------------
# Pallas kernel
# -----------------------------------------------------------------------------
def _make_flip_kernel(flip_h, flip_lane):
    """Kernel operating on one (bh, bl) tile.

    refs = (x_ref, [pr_ref], [q_ref], o_ref)  — presence of pr/q is static.
    """

    def kernel(*refs):
        o_ref = refs[-1]
        x = refs[0][...]
        idx = 1
        if flip_h:
            # Reverse the bh rows of the tile: antidiagonal permutation on MXU.
            x = jnp.dot(refs[idx][...], x,
                        preferred_element_type=jnp.float32).astype(o_ref.dtype)
            idx += 1
        if flip_lane:
            # Permute lanes (reverse W groups of size C and/or C inside groups).
            x = jnp.dot(x, refs[idx][...],
                        preferred_element_type=jnp.float32).astype(o_ref.dtype)
            idx += 1
        o_ref[...] = x

    return kernel


# -----------------------------------------------------------------------------
# Tile selection & permutation-matrix construction (host side, tiny)
# -----------------------------------------------------------------------------
def _pick_row_tile(H):
    for bh in (256, 128, 64, 32, 16, 8):
        if H % bh == 0:
            return bh
    return H  # full-dim fallback (still a legal block: equals the array dim)


def _pick_col_tile(W, C, max_lanes=512):
    upper = min(W, max_lanes // max(C, 1))
    for bw in range(upper, 0, -1):
        if W % bw == 0 and (bw * C) % 128 == 0:
            return bw
    return W  # full-dim fallback


def _row_flip_matrix(bh, dtype):
    return jnp.asarray(np.eye(bh, dtype=np.float32)[::-1].copy(), dtype=dtype)


def _lane_perm_matrix(bw, C, flip_w, flip_c, dtype):
    """(bw*C, bw*C) permutation: x_tile @ Q reverses W groups and/or C."""
    w = np.arange(bw)
    c = np.arange(C)
    src = (w[:, None] * C + c[None, :]).ravel()
    dw = (bw - 1 - w) if flip_w else w
    dc = (C - 1 - c) if flip_c else c
    dst = (dw[:, None] * C + dc[None, :]).ravel()
    q = np.zeros((bw * C, bw * C), dtype=np.float32)
    q[src, dst] = 1.0
    return jnp.asarray(q, dtype=dtype)


# -----------------------------------------------------------------------------
# Pallas-backed flip of a 2-D / 3-D image along canonical axes {0:H, 1:W, 2:C}
# -----------------------------------------------------------------------------
def _flip_pallas(img, flip_axes):
    x = jnp.asarray(img)
    if x.ndim == 2:
        H, W = x.shape
        C = 1
    elif x.ndim == 3:
        H, W, C = x.shape
    else:
        # TODO(synk): only 2-D / 3-D image arrays go through the Pallas path.
        raise ValueError(f"flip kernel supports 2-D or 3-D arrays, got {x.ndim}-D")

    flip_h = 0 in flip_axes
    flip_w = 1 in flip_axes
    flip_c = (2 in flip_axes) and x.ndim == 3
    if not (flip_h or flip_w or flip_c):
        return x

    orig_dtype = x.dtype
    orig_shape = x.shape

    # bf16 is exact for bool / (u)int8 sources and halves HBM/VMEM bytes.
    if orig_dtype in (jnp.bool_, jnp.uint8, jnp.int8):
        cdtype = jnp.bfloat16
    elif orig_dtype == jnp.bfloat16:
        cdtype = jnp.bfloat16
    else:
        cdtype = jnp.float32  # exact for f32 and integer values |v| < 2**24

    L = W * C
    x2 = x.reshape(H, L).astype(cdtype)  # free reshape: trailing dims merge

    bh = _pick_row_tile(H)
    bw = _pick_col_tile(W, C)
    bl = bw * C
    n_i, n_j = H // bh, W // bw
    flip_lane = flip_w or flip_c

    # Inter-tile flip handled by the (reversed) input index_map; output stays
    # identity-ordered and lane-dense.
    def x_index_map(i, j):
        bi = (n_i - 1 - i) if flip_h else i
        bj = (n_j - 1 - j) if flip_w else j
        return (bi, bj)

    operands = [x2]
    in_specs = [pl.BlockSpec((bh, bl), x_index_map)]
    if flip_h:
        operands.append(_row_flip_matrix(bh, cdtype))
        in_specs.append(pl.BlockSpec((bh, bh), lambda i, j: (0, 0)))  # resident
    if flip_lane:
        operands.append(_lane_perm_matrix(bw, C, flip_w, flip_c, cdtype))
        in_specs.append(pl.BlockSpec((bl, bl), lambda i, j: (0, 0)))  # resident

    out = pl.pallas_call(
        _make_flip_kernel(flip_h, flip_lane),
        out_shape=jax.ShapeDtypeStruct((H, L), cdtype),
        grid_spec=pltpu.PrefetchScalarGridSpec(
            num_scalar_prefetch=0,
            grid=(n_i, n_j),
            in_specs=in_specs,
            out_specs=pl.BlockSpec((bh, bl), lambda i, j: (i, j)),
        ),
        compiler_params=pltpu.CompilerParams(
            dimension_semantics=("parallel", "parallel"),
            vmem_limit_bytes=32 * 1024 * 1024,
        ),
    )(*operands)

    out = out.reshape(orig_shape)
    return out.astype(orig_dtype)


# -----------------------------------------------------------------------------
# Faithful ports of the reference helpers / module
# -----------------------------------------------------------------------------
def _normalize_axis(ax, ndim):
    a = int(ax)
    if a < 0:
        a += ndim
    if not 0 <= a < ndim:
        raise ValueError(f"axis {ax} out of bounds for a {ndim}-D array")
    return a


def flip_image(img, axis=None, axis_extra=None):
    """Pallas port of the reference flip_image.

    NOTE: like the reference, `if axis:` is a truthiness test, so axis=0 (or
    None) performs no flip for that argument.
    """
    x = jnp.asarray(img)
    toggles = [False] * x.ndim
    if axis:
        toggles[_normalize_axis(axis, x.ndim)] ^= True
    if axis_extra:
        toggles[_normalize_axis(axis_extra, x.ndim)] ^= True
    flip_axes = [a for a, t in enumerate(toggles) if t]
    if not flip_axes:
        return x
    return _flip_pallas(x, flip_axes)


def process_dict_of_imgs(dict_imgs, func, **kwargs):
    res = {}
    for key, val in dict_imgs.items():
        if isinstance(val, (np.ndarray, jnp.ndarray)):
            res[key] = func(val, **kwargs)
        else:
            res[key] = copy.deepcopy(val)
    return res


class RandomFlip:
    """JAX/Pallas port of the PyTorch RandomFlip transform."""

    def __init__(self, p_h=0.5, p_v=0.5, axis=None):
        self.p_h = p_h
        self.p_v = p_v
        self.axis = axis

    def forward(self, imgs):
        if self.axis is not None:
            if isinstance(imgs, (np.ndarray, jnp.ndarray)):
                return flip_image(imgs, axis=self.axis)
            return process_dict_of_imgs(imgs, flip_image, axis=self.axis)
        # Host-side RNG (kept outside the kernel, like the reference).
        self.axis = None if random.random() < self.p_h else 0
        axis_extra = None if random.random() < self.p_v else 1
        if isinstance(imgs, (np.ndarray, jnp.ndarray)):
            return flip_image(imgs, axis=self.axis, axis_extra=axis_extra)
        elif isinstance(imgs, dict):
            return process_dict_of_imgs(imgs, flip_image,
                                        axis=self.axis, axis_extra=axis_extra)
        else:
            raise ValueError(
                "input should be an array or a dictionary of arrays")

    __call__ = forward


# -----------------------------------------------------------------------------
# Self-test
# -----------------------------------------------------------------------------
if __name__ == "__main__":
    key = jax.random.PRNGKey(0)
    H, W, C = 16, 16, 4
    img = jax.random.uniform(key, (H, W, C), dtype=jnp.float32)
    img_np = np.asarray(img)

    # --- direct kernel checks against numpy.flip ------------------------------
    out_w = jax.block_until_ready(_flip_pallas(img, [1]))
    np.testing.assert_allclose(np.asarray(out_w), np.flip(img_np, 1), rtol=0, atol=0)

    out_hw = jax.block_until_ready(_flip_pallas(img, [0, 1]))
    np.testing.assert_allclose(np.asarray(out_hw),
                               np.flip(np.flip(img_np, 0), 1), rtol=0, atol=0)

    out_h2d = jax.block_until_ready(_flip_pallas(img[:, :, 0], [0]))
    np.testing.assert_allclose(np.asarray(out_h2d),
                               np.flip(img_np[:, :, 0], 0), rtol=0, atol=0)

    out_c = jax.block_until_ready(_flip_pallas(img, [2]))
    np.testing.assert_allclose(np.asarray(out_c), np.flip(img_np, 2), rtol=0, atol=0)

    # --- module with explicit axis (deterministic) -----------------------------
    rf1 = RandomFlip(axis=1)
    out1 = jax.block_until_ready(rf1(img))
    np.testing.assert_allclose(np.asarray(out1), np.flip(img_np, 1), rtol=0, atol=0)

    # --- module random path (seeded) on a dict of array / bool mask / scalar ---
    random.seed(0)
    exp_axis = None if random.random() < 0.5 else 0
    exp_extra = None if random.random() < 0.5 else 1
    exp_img = img_np.copy()
    exp_mask = img_np[:, :, 0] > 0.5
    if exp_axis:   # reference truthiness semantics (axis=0 never flips)
        exp_img = np.flip(exp_img, exp_axis)
        exp_mask = np.flip(exp_mask, exp_axis)
    if exp_extra:
        exp_img = np.flip(exp_img, exp_extra)
        exp_mask = np.flip(exp_mask, exp_extra)

    random.seed(0)
    rf2 = RandomFlip()
    out2 = rf2({"img": img,
                "mask": np.asarray(img[:, :, 0]) > 0.5,
                "meta": 42})
    jax.block_until_ready(out2["img"])
    np.testing.assert_allclose(np.asarray(out2["img"]), exp_img, rtol=0, atol=0)
    assert np.array_equal(np.asarray(out2["mask"]), exp_mask)
    assert out2["mask"].dtype == np.bool_
    assert out2["meta"] == 42

    print("KERNEL_OK")
</pallas_src>

<mosaic_0001>
module attributes {stable_mosaic.version = 11 : i64} {
  func.func @kernel(%arg0: i32, %arg1: i32, %arg2: memref<16x64xf32, #tpu.memory_space<vmem>>, %arg3: memref<64x64xf32, #tpu.memory_space<vmem>>, %arg4: memref<16x64xf32, #tpu.memory_space<vmem>>) attributes {dimension_semantics = [#tpu.dimension_semantics<parallel>, #tpu.dimension_semantics<parallel>], iteration_bounds = array<i64: 1, 1>, scalar_prefetch = 0 : i64, scratch_operands = 0 : i64, tpu.core_type = #tpu.core_type<tc>, window_params = [{transform_indices = @transform_0, window_bounds = array<i64: 16, 64>}, {pipeline_mode = #tpu.pipeline_mode<synchronous>, transform_indices = @transform_1, window_bounds = array<i64: 64, 64>}, {transform_indices = @transform_2, window_bounds = array<i64: 16, 64>}]} {
    %c0 = arith.constant 0 : index
    %c0_0 = arith.constant 0 : index
    %0 = vector.load %arg2[%c0, %c0_0] : memref<16x64xf32, #tpu.memory_space<vmem>>, vector<16x64xf32>
    %c0_1 = arith.constant 0 : index
    %c0_2 = arith.constant 0 : index
    %1 = vector.load %arg3[%c0_1, %c0_2] : memref<64x64xf32, #tpu.memory_space<vmem>>, vector<64x64xf32>
    %cst = arith.constant dense<0.000000e+00> : vector<16x64xf32>
    %2 = tpu.matmul %0, %1, %cst {dimension_numbers = #tpu.dot_dimension_numbers<[1], [0], [0], [1], [0, 0, 1, 1], [], []>} : vector<16x64xf32>, vector<64x64xf32>, vector<16x64xf32> -> vector<16x64xf32>
    %c0_3 = arith.constant 0 : index
    %c0_4 = arith.constant 0 : index
    %3 = vector.load %arg4[%c0_3, %c0_4] : memref<16x64xf32, #tpu.memory_space<vmem>>, vector<16x64xf32>
    tpu.vector_store %arg4[%c0_3, %c0_4], %2 {strides = array<i32>} : memref<16x64xf32, #tpu.memory_space<vmem>>, vector<16x64xf32>,
    return
  }
  func.func @transform_0(%arg0: i32, %arg1: i32) -> (i32, i32) {
    %c0_i32 = arith.constant 0 : i32
    %0 = arith.subi %c0_i32, %arg1 : i32
    %c0_i32_0 = arith.constant 0 : i32
    return %arg0, %0 : i32, i32
  }
  func.func @transform_1(%arg0: i32, %arg1: i32) -> (i32, i32) {
    %c0_i32 = arith.constant 0 : i32
    %c0_i32_0 = arith.constant 0 : i32
    %c0_i32_1 = arith.constant 0 : i32
    return %c0_i32, %c0_i32_0 : i32, i32
  }
  func.func @transform_2(%arg0: i32, %arg1: i32) -> (i32, i32) {
    %c0_i32 = arith.constant 0 : i32
    return %arg0, %arg1 : i32, i32
  }
}

</mosaic_0001>

<bundles_post_ra>
// kernel: tpu_custom_call.1
= control target key start
LH: loop header
LB: loop body
LE: loop exit
PB: predicated region body
PF: predicated region fallthrough
CT: control target
= control target key end

     0   :  { %7 = vsyncpa [#allocation3], 0  ;;  %s351_s0 = inlined_call_operand.hbm [shape: f32[16,64], index: 0, kind: input, shape index: {}]   ;;  %s352_s1 = inlined_call_operand.hbm [shape: f32[64,64], index: 1, kind: input, shape index: {}]   ;;  %s353_s2 = inlined_call_operand.hbm [shape: f32[16,64], index: 2, kind: output, shape index: {}]  }
   0x1   :  { %8 = vsyncpa [#allocation6], 0 }
   0x2   :  { %9 = vsyncpa [#allocation4], 0  ;;  %s282_s9 = smov [#allocation2]   ;;  %s210_s13 = scalar_lea.hbm %s351_s0, 256 }
   0x3   :  { %s18_s10 = sshll.u32 %s282_s9, 4  ;;  %p211_p0 = scmp.ne.s32.totalorder %s351_s0, %s210_s13  ;;  %s19_s10 = int_to_ptr.vmem [resolvable:$true] %s18_s10 }
   0x4   :  { %p214_p1 = scmp.lt.u32.totalorder %s210_s13, %s351_s0 }
   0x6   :  { %p216_p2 = pnand %p214_p1, %p211_p0 }
   0x8   :  { %219 = shalt.err (!%p216_p2)
}
   0x9   :  { %s220_s18 = scalar_lea.vmem %s19_s10, 256  ;;  %p225_p4 = scmp.lt.s32.totalorder %s19_s10, %s19_s10 }
   0xa   :  { %p221_p3 = scmp.ne.s32.totalorder %s19_s10, %s220_s18  ;;  %p226_p5 = scmp.lt.s32.totalorder %s220_s18, %s220_s18 }
   0xc   :  { %p227_p6 = por %p226_p5, %p225_p4 }
   0xe   :  { %p228_p7 = pnand %p227_p6, %p221_p3 }
  0x10   :  { %231 = shalt.err (!%p228_p7)
}
  0x11   :  { %s283_s19 = smov 128   ;;  %s284_s20 = smov 8  }
  0x12   :  { %24 = dma.hbm_to_vmem [thread:$0]  %s351_s0, 256, %s19_s10, [#allocation3], %s283_s19, %s283_s19, %s284_s20  }
  0x13   :  { %s285_s23 = smov [#allocation5]   ;;  %s232_s27 = scalar_lea.hbm %s352_s1, 1024 }
  0x14   :  { %s30_s24 = sshll.u32 %s285_s23, 4  ;;  %p233_p8 = scmp.ne.s32.totalorder %s352_s1, %s232_s27  ;;  %s31_s24 = int_to_ptr.vmem [resolvable:$true] %s30_s24 }
  0x15   :  { %p236_p9 = scmp.lt.u32.totalorder %s232_s27, %s352_s1 }
  0x17   :  { %p238_p10 = pnand %p236_p9, %p233_p8 }
  0x19   :  { %241 = shalt.err (!%p238_p10)
}
  0x1a   :  { %s242_s4 = scalar_lea.vmem %s31_s24, 1024  ;;  %p247_p12 = scmp.lt.s32.totalorder %s31_s24, %s31_s24 }
  0x1b   :  { %p243_p11 = scmp.ne.s32.totalorder %s31_s24, %s242_s4  ;;  %p248_p13 = scmp.lt.s32.totalorder %s242_s4, %s242_s4 }
  0x1d   :  { %p249_p0 = por %p248_p13, %p247_p12 }
  0x1f   :  { %p250_p1 = pnand %p249_p0, %p243_p11 }
  0x21   :  { %253 = shalt.err (!%p250_p1)
}
  0x22   :  { %36 = dma.hbm_to_vmem [thread:$0]  %s352_s1, 1024, %s31_s24, [#allocation6], %s283_s19, %s283_s19, %s284_s20  }
  0x23   :  { %276 = dma.done.wait [#allocation3], 256  }
  0x24   :  { %277 = vsyncadd [#allocation3], 4294967040 }
  0x25   :  { %278 = dma.done.wait [#allocation6], 1024  }
  0x26   :  { %279 = vsyncadd [#allocation6], 4294966272  ;;  %v46_v0 = vld [vmem:[#allocation5] sm:$0xff]  ;;  %v47_v1 = vld [vmem:[#allocation5 + $0x8] sm:$0xff]  ;;  %vm54_vm0 = vcmask 523264   ;;  %s286_s1 = smov [#allocation7]  }
  0x27   :  { %v48_v2 = vld [vmem:[#allocation5 + $0x10] sm:$0xff]  ;;  %v189_v3 = vpack.c.bf16 %v47_v1, %v46_v0  ;;  %v49_v4 = vld [vmem:[#allocation5 + $0x18] sm:$0xff]  ;;  %v50_v6 = vld [vmem:[#allocation5 + $0x20] sm:$0xff]  ;;  %s143_s6 = sshll.u32 %s286_s1, 4  ;;  %s144_s6 = int_to_ptr.vmem [resolvable:$true] %s143_s6 }
  0x28   :  { %v193_v5 = vpack.c.bf16 %v49_v4, %v48_v2  ;;  %v51_v7 = vld [vmem:[#allocation5 + $0x28] sm:$0xff]  ;;  %v44_v8 = vld [vmem:[#allocation2] sm:$0xff]  ;;  %v53_v11 = vld [vmem:[#allocation5 + $0x38] sm:$0xff]  ;;  %s254_s7 = scalar_lea.vmem %s144_s6, 256  ;;  %p259_p3 = scmp.lt.s32.totalorder %s144_s6, %s144_s6 }
  0x29   :  { %190 = vmatprep.subr.bf16.mxu0 %v189_v3  ;;  %186 = vmatprep.mubr.msk.f32.mxu0 %vm54_vm0, %v44_v8  ;;  %v197_v9 = vpack.c.bf16 %v51_v7, %v50_v6  ;;  %v52_v10 = vld [vmem:[#allocation5 + $0x30] sm:$0xff]  ;;  %v45_v13 = vld [vmem:[#allocation2 + $0x8] sm:$0xff]  ;;  %p255_p2 = scmp.ne.s32.totalorder %s144_s6, %s254_s7  ;;  %p260_p4 = scmp.lt.s32.totalorder %s254_s7, %s254_s7 }
  0x2a   :  { %192 = vmatpush3.bf16.msra.mxu0 %v189_v3  ;;  %v201_v12 = vpack.c.bf16 %v53_v11, %v52_v10 }
  0x2b   :  { %194 = vmatprep.subr.bf16.mxu0 %v193_v5  ;;  %p261_p5 = por %p260_p4, %p259_p3 }
  0x2d   :  { %p262_p6 = pnand %p261_p5, %p255_p2 }
  0x2e   :  { %196 = vmatpush3.bf16.msra.mxu0 %v193_v5 }
  0x2f   :  { %198 = vmatprep.subr.bf16.mxu0 %v197_v9 }
  0x32   :  { %200 = vmatpush3.bf16.msra.mxu0 %v197_v9 }
  0x33   :  { %202 = vmatprep.subr.bf16.mxu0 %v201_v12 }
  0x36   :  { %204 = vmatpush3.bf16.msra.mxu0 %v201_v12 }
  0x39   :  { %187 = vmatmul.mubr.msk.f32.vlgmr.msra.gmra.mrb[0].mxu0 %vm54_vm0, %v45_v13 }
 0x10c   :  { %v188_v14 = vpop.f32.mrb[0].mxu0 }
 0x10d   :  { %137 = vst.msk [vmem:[#allocation7 + $0x8] sm:$0xff] %vm54_vm0, %v188_v14  ;;  %v127_v15 = vpop.f32.mrb[1].mxu0 }
 0x10e   :  { %136 = vst.msk [vmem:[#allocation7] sm:$0xff] %vm54_vm0, %v127_v15 }
 0x10f   :  { %265 = shalt.err (!%p262_p6)
}
 0x110   :  { %s266_s10 = scalar_lea.hbm %s353_s2, 256 }
 0x111   :  { %p267_p7 = scmp.ne.s32.totalorder %s353_s2, %s266_s10  ;;  %p270_p8 = scmp.lt.u32.totalorder %s266_s10, %s353_s2 }
 0x113   :  { %p272_p9 = pnand %p270_p8, %p267_p7 }
 0x115   :  { %275 = shalt.err (!%p272_p9)
}
 0x116   :  { %149 = dma.vmem_to_hbm [thread:$0]  %s144_s6, 256, %s353_s2, [#allocation4], %s283_s19, %s283_s19, %s284_s20  }
 0x117   :  { %280 = dma.done.wait [#allocation4], 256  }
 0x118   :  { %281 = vsyncadd [#allocation4], 4294967040 }
 0x119   :  { %153 = vsyncpa [#allocation3], 1 }
 0x11a   :  { %154 = vsyncpa [#allocation6], 1 }
 0x11b   :  { %155 = vsyncpa [#allocation4], 1 }

</bundles_post_ra>
